<compile_context>
chip_gen: v7x
topology: tpu7x:2x2x1
jax: 0.10.0
libtpu: 0.0.40
codegen_flags: <defaults>
</compile_context>

<pallas_src>
import functools

import jax
import jax.numpy as jnp
from jax.experimental import pallas as pl
from jax.experimental.pallas import tpu as pltpu


def _round_up(x, m):
    return ((x + m - 1) // m) * m


def linear_kernel(x_ref, w_ref, b_ref, o_ref):
    # x_ref: (TILE_B, F) f32 in VMEM
    # w_ref: (1, F)      f32 in VMEM  (torch layout, lane-dense, reused every tile)
    # b_ref: (1,)        f32 in SMEM  (scalar bias)
    # o_ref: (1, TILE_B) f32 in VMEM  (lane-dense output slab)
    x = x_ref[...]
    w = w_ref[...]
    b = b_ref[0]

    prod = x * w                                    # VPU broadcast multiply, (TILE_B, F)
    # Put the batch on lanes (XLU transpose), then reduce the 13 features over
    # sublanes: the result (1, TILE_B) is already lane-dense for an unmasked store.
    prod_t = prod.T                                 # (F, TILE_B)
    y = jnp.sum(prod_t, axis=0, keepdims=True) + b  # (1, TILE_B)
    o_ref[...] = y.astype(o_ref.dtype)


@functools.partial(jax.jit, static_argnames=("tile_b",))
def linear_forward(x, weight, bias, *, tile_b=1024):
    """x: (B, F) f32; weight: (1, F) f32 (torch layout); bias: (1,) f32 -> (B, 1) f32."""
    B, F = x.shape
    x = x.astype(jnp.float32)
    w_row = weight.astype(jnp.float32).reshape(1, F)   # keep lane-dense, no transpose
    b_smem = bias.astype(jnp.float32).reshape(1)       # scalar, lives in SMEM

    if B <= tile_b:
        # Single tile covering the (sublane-padded) batch.
        tile_b = _round_up(B, 8)
    else:
        # Multi-tile: tile must be sublane-aligned for the x block and
        # lane-aligned for the (1, TILE_B) output block.
        tile_b = _round_up(tile_b, 128)
    b_pad = _round_up(B, tile_b)
    if b_pad != B:
        x = jnp.pad(x, ((0, b_pad - B), (0, 0)))
    num_tiles = b_pad // tile_b

    out_row = pl.pallas_call(
        linear_kernel,
        out_shape=jax.ShapeDtypeStruct((1, b_pad), jnp.float32),
        grid=(num_tiles,),
        in_specs=[
            pl.BlockSpec((tile_b, F), lambda i: (i, 0)),          # x batch tile
            pl.BlockSpec((1, F), lambda i: (0, 0)),               # weight row (resident)
            pl.BlockSpec(memory_space=pltpu.MemorySpace.SMEM),    # bias scalar
        ],
        out_specs=pl.BlockSpec((1, tile_b), lambda i: (0, i)),    # lane-dense slab
        compiler_params=pltpu.CompilerParams(
            # Batch tiles are independent: parallel lets v7x split the grid
            # across both TensorCores; neutral on single-TC v5e/v6e.
            dimension_semantics=("parallel",),
        ),
    )(x, w_row, b_smem)

    # Back to the torch output layout (B, 1); drop any batch padding.
    return out_row.reshape(-1)[:B].reshape(B, 1)


if __name__ == "__main__":
    # Boston housing has 13 features; use a small batch.
    num_features = 13
    batch = 8

    key = jax.random.PRNGKey(0)
    k_x, k_w, k_b = jax.random.split(key, 3)

    x = jax.random.normal(k_x, (batch, num_features), dtype=jnp.float32)

    # Deterministic parameter init mimicking torch.nn.Linear's default:
    # U(-1/sqrt(in_features), 1/sqrt(in_features))
    bound = 1.0 / (num_features ** 0.5)
    weight = jax.random.uniform(k_w, (1, num_features), minval=-bound, maxval=bound,
                                dtype=jnp.float32)
    bias = jax.random.uniform(k_b, (1,), minval=-bound, maxval=bound, dtype=jnp.float32)

    out = linear_forward(x, weight, bias)
    out = jax.block_until_ready(out)

    # Pure-JAX reference check.
    ref = x @ weight.T + bias
    assert out.shape == (batch, 1), out.shape
    assert jnp.allclose(out, ref, atol=1e-5, rtol=1e-5), "mismatch vs reference"

    print("KERNEL_OK")
</pallas_src>

<mosaic_0001>
module attributes {stable_mosaic.version = 11 : i64} {
  func.func @linear_kernel(%arg0: i32, %arg1: memref<8x13xf32, #tpu.memory_space<vmem>>, %arg2: memref<1x13xf32, #tpu.memory_space<vmem>>, %arg3: memref<1xf32, #tpu.memory_space<smem>>, %arg4: memref<1x8xf32, #tpu.memory_space<vmem>>) attributes {dimension_semantics = [#tpu.dimension_semantics<parallel>], iteration_bounds = array<i64: 1>, scalar_prefetch = 0 : i64, scratch_operands = 0 : i64, tpu.core_type = #tpu.core_type<tc>, window_params = [{transform_indices = @transform_0, window_bounds = array<i64: 8, 13>}, {pipeline_mode = #tpu.pipeline_mode<synchronous>, transform_indices = @transform_1, window_bounds = array<i64: 1, 13>}, {transform_indices = @transform_2, window_bounds = array<i64: 1>}, {transform_indices = @transform_3, window_bounds = array<i64: 1, 8>}]} {
    %c0 = arith.constant 0 : index
    %c0_0 = arith.constant 0 : index
    %0 = vector.load %arg1[%c0, %c0_0] : memref<8x13xf32, #tpu.memory_space<vmem>>, vector<8x13xf32>
    %c0_1 = arith.constant 0 : index
    %c0_2 = arith.constant 0 : index
    %1 = vector.load %arg2[%c0_1, %c0_2] : memref<1x13xf32, #tpu.memory_space<vmem>>, vector<1x13xf32>
    %c0_3 = arith.constant 0 : index
    %2 = memref.load %arg3[%c0_3] : memref<1xf32, #tpu.memory_space<smem>>
    %3 = vector.broadcast %1 : vector<1x13xf32> to vector<8x13xf32>
    %4 = arith.mulf %0, %3 : vector<8x13xf32>
    %5 = tpu.transpose %4, [1, 0] : vector<8x13xf32> -> vector<13x8xf32>
    %cst = arith.constant dense<0.000000e+00> : vector<8xf32>
    %6 = vector.multi_reduction <add>, %5, %cst [0] : vector<13x8xf32> to vector<8xf32>
    %7 = vector.shape_cast %6 : vector<8xf32> to vector<1x8xf32>
    %8 = vector.broadcast %2 : f32 to vector<1x8xf32>
    %9 = arith.addf %7, %8 : vector<1x8xf32>
    %c0_4 = arith.constant 0 : index
    %c0_5 = arith.constant 0 : index
    %10 = vector.load %arg4[%c0_4, %c0_5] : memref<1x8xf32, #tpu.memory_space<vmem>>, vector<1x8xf32>
    tpu.vector_store %arg4[%c0_4, %c0_5], %9 {strides = array<i32>} : memref<1x8xf32, #tpu.memory_space<vmem>>, vector<1x8xf32>,
    return
  }
  func.func @transform_0(%arg0: i32) -> (i32, i32) {
    %c0_i32 = arith.constant 0 : i32
    %c0_i32_0 = arith.constant 0 : i32
    return %arg0, %c0_i32 : i32, i32
  }
  func.func @transform_1(%arg0: i32) -> (i32, i32) {
    %c0_i32 = arith.constant 0 : i32
    %c0_i32_0 = arith.constant 0 : i32
    %c0_i32_1 = arith.constant 0 : i32
    return %c0_i32, %c0_i32_0 : i32, i32
  }
  func.func @transform_2(%arg0: i32) -> i32 {
    %c0_i32 = arith.constant 0 : i32
    %c0_i32_0 = arith.constant 0 : i32
    return %c0_i32 : i32
  }
  func.func @transform_3(%arg0: i32) -> (i32, i32) {
    %c0_i32 = arith.constant 0 : i32
    %c0_i32_0 = arith.constant 0 : i32
    return %c0_i32, %arg0 : i32, i32
  }
}

</mosaic_0001>

<bundles_post_ra>
// kernel: linear_forward.1
= control target key start
LH: loop header
LB: loop body
LE: loop exit
PB: predicated region body
PF: predicated region fallthrough
CT: control target
= control target key end

     0   :  { %9 = vsyncpa [#allocation4], 0  ;;  %s204_s0 = inlined_call_operand.hbm [shape: f32[8,13], index: 0, kind: input, shape index: {}]   ;;  %s205_s1 = inlined_call_operand.vmem [shape: f32[1,13], index: 1, kind: input, shape index: {}]   ;;  %s206_s2 = inlined_call_operand.<no memory space> [shape: f32[1], index: 2, kind: input, shape index: {}]   ;;  %s207_s3 = inlined_call_operand.hbm [shape: f32[1,8], index: 3, kind: output, shape index: {}]  }
   0x1   :  { %10 = vsyncpa [#allocation5], 0  ;;  %s152_s12 = smov [#allocation3]   ;;  %s104_s16 = scalar_lea.hbm %s204_s0, 128 }
   0x2   :  { %s17_s13 = sshll.u32 %s152_s12, 4  ;;  %p105_p0 = scmp.ne.s32.totalorder %s204_s0, %s104_s16  ;;  %s18_s13 = int_to_ptr.vmem [resolvable:$true] %s17_s13 }
   0x3   :  { %p108_p1 = scmp.lt.u32.totalorder %s104_s16, %s204_s0 }
   0x5   :  { %p110_p2 = pnand %p108_p1, %p105_p0 }
   0x7   :  { %113 = shalt.err (!%p110_p2)
}
   0x8   :  { %s114_s21 = scalar_lea.vmem %s18_s13, 128  ;;  %p119_p4 = scmp.lt.s32.totalorder %s18_s13, %s18_s13 }
   0x9   :  { %p115_p3 = scmp.ne.s32.totalorder %s18_s13, %s114_s21  ;;  %p120_p5 = scmp.lt.s32.totalorder %s114_s21, %s114_s21 }
   0xb   :  { %p121_p6 = por %p120_p5, %p119_p4 }
   0xd   :  { %p122_p7 = pnand %p121_p6, %p115_p3 }
   0xf   :  { %125 = shalt.err (!%p122_p7)
}
  0x10   :  { %20 = dma.hbm_to_vmem [thread:$0]  %s204_s0, 128, %s18_s13, [#allocation4]  }
  0x11   :  { %148 = dma.done.wait [#allocation4], 128  }
  0x12   :  { %149 = vsyncadd [#allocation4], 4294967168  ;;  %v28_v0 = vld [vmem:[#allocation3] sm:$0xff]  ;;  %vm70_vm0 = vcmask 64512   ;;  %vm72_vm1 = vcmask 61440   ;;  %v81_v13 = vstv %s206_s2  ;;  %s153_s27 = smov [#allocation6]  }
  0x13   :  { %v100_v1 = vld [vmem:[%s205_s1] ss:$0 sm:$0xff]  ;;  %s91_s1 = sshll.u32 %s153_s27, 4  ;;  %vm83_vm2 = vcmask 57344   ;;  %s92_s1 = int_to_ptr.vmem [resolvable:$true] %s91_s1 }
  0x14   :  { %v37_v2 = vmul.f32 %v100_v1, %v28_v0  ;;  %s126_s28 = scalar_lea.vmem %s92_s1, 16  ;;  %s130_s29 = scalar_lea.vmem %s92_s1, 32 }
  0x15   :  { %p127_p8 = scmp.ne.s32.totalorder %s92_s1, %s126_s28  ;;  %p131_p9 = scmp.lt.s32.totalorder %s92_s1, %s92_s1 }
  0x16   :  { %38 = vxpose.xlu0.b32.start.end [1/1] (short) (narrow) %v37_v2, 16  ;;  %p132_p10 = scmp.lt.s32.totalorder %s130_s29, %s126_s28 }
  0x18   :  { %p133_p11 = por %p132_p10, %p131_p9 }
  0x1a   :  { %p134_p12 = pnand %p133_p11, %p127_p8 }
  0x96   :  { %v54_v3 = vpop.trf.xlu0 }
  0x97   :  { %v71_v5 = vsel %vm70_vm0, %v54_v3, 0.0 }
  0x9a   :  { %v55_v4 = vpop.trf.xlu0 }
  0x9b   :  { %v73_v6 = vsel %vm72_vm1, %v55_v4, 0.0 }
  0x9c   :  { %v74_v7 = vadd.f32 %v73_v6, %v71_v5 }
  0x9e   :  { %v75_v8 = vrot.slane %v74_v7, 4 }
  0xa0   :  { %v76_v9 = vadd.f32 %v75_v8, %v74_v7 }
  0xa2   :  { %v77_v10 = vrot.slane %v76_v9, 2 }
  0xa4   :  { %v78_v11 = vadd.f32 %v77_v10, %v76_v9 }
  0xa6   :  { %v79_v12 = vrot.slane %v78_v11, 1 }
  0xa8   :  { %v80_v14 = vadd.f32 %v79_v12, %v78_v11 }
  0xaa   :  { %v82_v15 = vadd.f32 %v81_v13, %v80_v14 }
  0xac   :  { %84 = vst.msk [vmem:[#allocation6] sm:$0x1] %vm83_vm2, %v82_v15 }
  0xad   :  { %137 = shalt.err (!%p134_p12)
}
  0xae   :  { %s138_s5 = scalar_lea.hbm %s207_s3, 16 }
  0xaf   :  { %p139_p13 = scmp.ne.s32.totalorder %s207_s3, %s138_s5  ;;  %p142_p0 = scmp.lt.u32.totalorder %s138_s5, %s207_s3 }
  0xb1   :  { %p144_p1 = pnand %p142_p0, %p139_p13 }
  0xb3   :  { %147 = shalt.err (!%p144_p1)
}
  0xb4   :  { %94 = dma.vmem_to_hbm [thread:$0]  %s92_s1, 16, %s207_s3, [#allocation5]  }
  0xb5   :  { %150 = dma.done.wait [#allocation5], 16  }
  0xb6   :  { %151 = vsyncadd [#allocation5], 4294967280 }
  0xb7   :  { %98 = vsyncpa [#allocation4], 1 }
  0xb8   :  { %99 = vsyncpa [#allocation5], 1 }

</bundles_post_ra>
